<compile_context>
chip_gen: v7x
topology: tpu7x:2x2x1
jax: 0.10.0
libtpu: 0.0.40
codegen_flags: <defaults>
</compile_context>

<pallas_src>
import functools

import jax
import jax.numpy as jnp
from jax import lax
from jax.experimental import pallas as pl
from jax.experimental.pallas import tpu as pltpu


def _up_kernel(geom, x1a_ref, x2_ref, coords_ref, wup_ref, w1_ref, b1_ref,
               w2_ref, b2_ref, o_ref):
    """Fused Up forward for one batch block (channels x (bb*H*W) layout)."""
    H2, W2, pt, pL, Hu, Wu, cp = geom
    f32 = jnp.float32
    L = o_ref.shape[-1]

    x1a = x1a_ref[0].astype(f32)          # (Cin+1, L): replicated x1 + ones row
    x2 = x2_ref[0].astype(f32)            # (C2p, L)   skip connection (padded)
    hh = coords_ref[0:1, :]               # (1, L) int32 row index within image
    ww = coords_ref[1:2, :]               # (1, L) int32 col index within image

    # --- ConvTranspose2d(k=2, s=2): one stacked matmul (bias folded via the
    #     ones row) + 4-way parity-mask select; the zero padding of the
    #     upsampled map is implied (masked-out positions stay 0). -------------
    ups = jnp.dot(wup_ref[...], x1a, preferred_element_type=f32)   # (4*cp, L)
    row_in = (hh >= pt) & (hh < pt + Hu)
    col_in = (ww >= pL) & (ww < pL + Wu)
    rmask = [row_in & (((hh - pt) & 1) == py) for py in (0, 1)]
    cmask = [col_in & (((ww - pL) & 1) == px) for px in (0, 1)]
    up = None
    for p, (py, px) in enumerate(((0, 0), (0, 1), (1, 0), (1, 1))):
        m = jnp.where(rmask[py] & cmask[px], 1.0, 0.0)
        term = m * ups[p * cp:(p + 1) * cp, :]       # cp is sublane-aligned
        up = term if up is None else up + term

    # torch.cat([x2, up], dim=1); both blocks are 8-row aligned.
    cat = jnp.concatenate([x2, up], axis=0)                        # (Ccat_p, L)

    # --- 3x3 tap validity masks (computed once, reused by both convs).
    #     Every lane a roll wraps (or that crosses into the neighbouring image
    #     in the batch-in-lanes layout) is exactly an out-of-bounds lane. ------
    tmask = {}
    for ky in (-1, 0, 1):
        for kx in (-1, 0, 1):
            if ky == 0 and kx == 0:
                continue
            ok = None
            if ky == -1:
                ok = hh >= 1
            elif ky == 1:
                ok = hh < H2 - 1
            if kx == -1:
                ok = (ww >= 1) if ok is None else (ok & (ww >= 1))
            elif kx == 1:
                ok = (ww < W2 - 1) if ok is None else (ok & (ww < W2 - 1))
            tmask[(ky, kx)] = jnp.where(ok, 1.0, 0.0)

    # --- 3x3 conv (pad=1), BN folded into weights, as one combined-K matmul ---
    def conv3x3(v, w_ref, b_ref):
        taps = []
        for ky in (-1, 0, 1):
            for kx in (-1, 0, 1):
                d = ky * W2 + kx                      # lane offset of the tap
                if d == 0:
                    taps.append(v)                    # centre tap: no roll/mask
                else:
                    rolled = pltpu.roll(v, (-d) % L, axis=1)   # XLU rotate
                    taps.append(rolled * tmask[(ky, kx)])
        col = jnp.concatenate(taps, axis=0)           # (9*C_p, L), aligned
        return jnp.dot(w_ref[...], col, preferred_element_type=f32) + b_ref[...]

    y = jnp.maximum(conv3x3(cat, w1_ref, b1_ref), 0.0)   # conv1 + BN1 + ReLU
    y = jnp.maximum(conv3x3(y, w2_ref, b2_ref), 0.0)     # conv2 + BN2 + ReLU
    o_ref[0] = y.astype(o_ref.dtype)


def _round_up(x, m):
    return (x + m - 1) // m * m


def up_pallas(x1, x2, params, eps=1e-5):
    """Forward pass of Up(bilinear=False) with eval-mode BatchNorm."""
    f32 = jnp.float32
    N, Cin, H1, W1 = x1.shape
    N2, C2, H2, W2 = x2.shape
    assert N == N2
    wup = params["up_w"]                             # (Cin, Cin//2, 2, 2)
    c_half = wup.shape[1]
    Cmid, Ccat = params["c1_w"].shape[0], params["c1_w"].shape[1]
    Cout = params["c2_w"].shape[0]
    assert Ccat == C2 + c_half, (Ccat, C2, c_half)

    Hu, Wu = 2 * H1, 2 * W1
    dy, dx = H2 - Hu, W2 - Wu
    assert dy >= 0 and dx >= 0
    pt, pL = dy // 2, dx // 2
    HW = H2 * W2

    SUB = 8                                          # f32 sublane multiple
    cp = _round_up(c_half, SUB)                      # padded up-channels
    C2p = _round_up(C2, SUB)                         # padded skip channels
    Ccat_p = C2p + cp
    Cmid_p = _round_up(Cmid, SUB)
    Cout_p = _round_up(Cout, SUB)
    Cin_aug = Cin + 1                                # + ones row (ConvT bias)

    # Batch blocking: fattest per-step tile that still leaves >= 2 grid steps.
    bb = 1
    if N >= 2:
        for d in range(N // 2, 0, -1):
            if N % d == 0:
                bb = d
                break
    S = N // bb
    L = bb * HW

    # --- layout plumbing (native dtype; no f32 upcast) ------------------------
    # Nearest-replicate + zero-pad x1 onto the x2 grid so the transposed conv
    # is one matmul per lane selected by parity masks; append a ones channel
    # that carries the ConvTranspose bias through the matmul.
    x1n = jnp.repeat(jnp.repeat(x1, 2, axis=2), 2, axis=3)
    x1n = jnp.pad(x1n, ((0, 0), (0, 0), (pt, dy - pt), (pL, dx - pL)))
    x1n = x1n.reshape(N, Cin, HW)
    x1a = jnp.concatenate([x1n, jnp.ones((N, 1, HW), x1n.dtype)], axis=1)

    x2p = jnp.pad(x2.reshape(N, C2, HW), ((0, 0), (0, C2p - C2), (0, 0)))

    def to_steps(a):                                 # (N, C, HW) -> (S, C, L)
        C = a.shape[1]
        return a.reshape(S, bb, C, HW).transpose(0, 2, 1, 3).reshape(S, C, L)

    x1a_s, x2_s = to_steps(x1a), to_steps(x2p)

    # Per-lane (row, col) image coordinates; all masks derive in-kernel.
    hh = jnp.broadcast_to(jnp.arange(H2, dtype=jnp.int32)[:, None], (H2, W2))
    ww = jnp.broadcast_to(jnp.arange(W2, dtype=jnp.int32)[None, :], (H2, W2))
    coords = jnp.tile(jnp.stack([hh.reshape(HW), ww.reshape(HW)]), (1, bb))

    # --- fold eval-mode BatchNorm into conv weights (linear pre-compose) ------
    def bn_fold(w, g, b, m, v):
        s = g / jnp.sqrt(v + eps)
        return w * s[:, None, None, None], b - m * s

    w1s, sh1 = bn_fold(params["c1_w"], params["bn1_g"], params["bn1_b"],
                       params["bn1_m"], params["bn1_v"])
    w2s, sh2 = bn_fold(params["c2_w"], params["bn2_g"], params["bn2_b"],
                       params["bn2_m"], params["bn2_v"])

    # --- weight packing: (Cout_p, K) layouts with sublane-aligned channels ----
    # Transposed conv: rows = 4 parity blocks of cp channels; cols = x1
    # channels + a bias column (matched to the ones row of x1a).
    w_par = jnp.transpose(wup, (2, 3, 1, 0)).astype(f32)   # (2,2,c_half,Cin)
    wup_f = jnp.zeros((4 * cp, Cin_aug), f32)
    for p, (py, px) in enumerate(((0, 0), (0, 1), (1, 0), (1, 1))):
        wup_f = wup_f.at[p * cp:p * cp + c_half, :Cin].set(w_par[py, px])
        wup_f = wup_f.at[p * cp:p * cp + c_half, Cin].set(
            params["up_b"].astype(f32))

    def pack_conv3x3(w, shift, segs, cin_p, cout_p):
        # w: (O, I, 3, 3); segs maps original input-channel ranges into the
        # padded channel layout used by the in-kernel concat.
        O = w.shape[0]
        wemb = jnp.zeros((O, cin_p, 3, 3), f32)
        for src, dst, n in segs:
            wemb = wemb.at[:, dst:dst + n].set(w[:, src:src + n].astype(f32))
        wtap = jnp.transpose(wemb, (0, 2, 3, 1)).reshape(O, 9 * cin_p)
        wpad = jnp.zeros((cout_p, 9 * cin_p), f32).at[:O].set(wtap)
        bpad = jnp.zeros((cout_p, 1), f32).at[:O, 0].set(shift.astype(f32))
        return wpad, bpad

    w1f, b1f = pack_conv3x3(w1s, sh1, [(0, 0, C2), (C2, C2p, c_half)],
                            Ccat_p, Cmid_p)
    w2f, b2f = pack_conv3x3(w2s, sh2, [(0, 0, Cmid)], Cmid_p, Cout_p)

    consts = (coords, wup_f, w1f, b1f, w2f, b2f)
    geom = (H2, W2, pt, pL, Hu, Wu, cp)

    out_s = pl.pallas_call(
        functools.partial(_up_kernel, geom),
        out_shape=jax.ShapeDtypeStruct((S, Cout_p, L), x2.dtype),
        grid=(S,),
        in_specs=[pl.BlockSpec((1, Cin_aug, L), lambda s: (s, 0, 0)),
                  pl.BlockSpec((1, C2p, L), lambda s: (s, 0, 0))]
                 + [pl.BlockSpec(c.shape, lambda s: (0, 0)) for c in consts],
        out_specs=pl.BlockSpec((1, Cout_p, L), lambda s: (s, 0, 0)),
        compiler_params=pltpu.CompilerParams(
            dimension_semantics=("parallel",)),
    )(x1a_s, x2_s, *consts)

    out = out_s.reshape(S, Cout_p, bb, HW).transpose(0, 2, 1, 3)
    out = out.reshape(N, Cout_p, HW)[:, :Cout].reshape(N, Cout, H2, W2)
    return out


# ------------------------- pure-JAX reference (NCHW) -------------------------
def up_ref(x1, x2, params, eps=1e-5):
    N, Cin, H1, W1 = x1.shape
    wup, bup = params["up_w"], params["up_b"]
    c_half = wup.shape[1]
    # ConvTranspose2d(k=2,s=2): out[n,o,2i+k,2j+l] = sum_c x1[n,c,i,j]*w[c,o,k,l]+b
    y = jnp.einsum("nchw,cokl->nohwkl", x1, wup)
    y = jnp.transpose(y, (0, 1, 2, 4, 3, 5)).reshape(N, c_half, 2 * H1, 2 * W1)
    y = y + bup.reshape(1, -1, 1, 1)
    H2, W2 = x2.shape[2], x2.shape[3]
    dy, dx = H2 - y.shape[2], W2 - y.shape[3]
    y = jnp.pad(y, ((0, 0), (0, 0), (dy // 2, dy - dy // 2),
                    (dx // 2, dx - dx // 2)))
    x = jnp.concatenate([x2, y], axis=1)

    dn = ("NCHW", "OIHW", "NCHW")

    def conv_bn_relu(xx, w, g, b, m, v):
        yy = lax.conv_general_dilated(xx, w, (1, 1), [(1, 1), (1, 1)],
                                      dimension_numbers=dn)
        scale = g / jnp.sqrt(v + eps)
        yy = yy * scale.reshape(1, -1, 1, 1) + (b - m * scale).reshape(1, -1, 1, 1)
        return jnp.maximum(yy, 0.0)

    x = conv_bn_relu(x, params["c1_w"], params["bn1_g"], params["bn1_b"],
                     params["bn1_m"], params["bn1_v"])
    x = conv_bn_relu(x, params["c2_w"], params["bn2_g"], params["bn2_b"],
                     params["bn2_m"], params["bn2_v"])
    return x


if __name__ == "__main__":
    # Small shapes consistent with Up(in_channels=8, out_channels=4):
    # x1: deep feature (N, 8, 8, 8); x2: skip (N, 4, 16, 16); out: (N, 4, 16, 16)
    N, Cin, Cout = 2, 8, 4
    Chalf = Cin // 2
    H1 = W1 = 8

    key = jax.random.PRNGKey(0)
    ks = jax.random.split(key, 16)

    def nrm(k, shape, s=0.1):
        return s * jax.random.normal(k, shape, dtype=jnp.float32)

    params = {
        "up_w": nrm(ks[0], (Cin, Chalf, 2, 2)),
        "up_b": nrm(ks[1], (Chalf,)),
        "c1_w": nrm(ks[2], (Cout, Cin, 3, 3)),        # DoubleConv mid == out
        "bn1_g": 1.0 + nrm(ks[3], (Cout,)),
        "bn1_b": nrm(ks[4], (Cout,)),
        "bn1_m": nrm(ks[5], (Cout,)),
        "bn1_v": 0.5 + 0.5 * jax.random.uniform(ks[6], (Cout,), dtype=jnp.float32),
        "c2_w": nrm(ks[7], (Cout, Cout, 3, 3)),
        "bn2_g": 1.0 + nrm(ks[8], (Cout,)),
        "bn2_b": nrm(ks[9], (Cout,)),
        "bn2_m": nrm(ks[10], (Cout,)),
        "bn2_v": 0.5 + 0.5 * jax.random.uniform(ks[11], (Cout,), dtype=jnp.float32),
    }
    x1 = jax.random.normal(ks[12], (N, Cin, H1, W1), dtype=jnp.float32)
    x2 = jax.random.normal(ks[13], (N, Chalf, 2 * H1, 2 * W1), dtype=jnp.float32)

    out = jax.block_until_ready(jax.jit(up_pallas)(x1, x2, params))
    ref = jax.block_until_ready(up_ref(x1, x2, params))

    assert out.shape == (N, Cout, 2 * H1, 2 * W1), out.shape
    max_err = float(jnp.max(jnp.abs(out - ref)))
    if max_err > 2e-3:
        raise AssertionError(f"Pallas Up mismatch vs reference: {max_err}")
    print("KERNEL_OK")
</pallas_src>

<mosaic_0001>
module attributes {stable_mosaic.version = 11 : i64} {
  func.func @_up_kernel(%arg0: i32, %arg1: memref<1x9x256xf32, #tpu.memory_space<vmem>>, %arg2: memref<1x8x256xf32, #tpu.memory_space<vmem>>, %arg3: memref<2x256xi32, #tpu.memory_space<vmem>>, %arg4: memref<32x9xf32, #tpu.memory_space<vmem>>, %arg5: memref<8x144xf32, #tpu.memory_space<vmem>>, %arg6: memref<8x1xf32, #tpu.memory_space<vmem>>, %arg7: memref<8x72xf32, #tpu.memory_space<vmem>>, %arg8: memref<8x1xf32, #tpu.memory_space<vmem>>, %arg9: memref<1x8x256xf32, #tpu.memory_space<vmem>>) attributes {dimension_semantics = [#tpu.dimension_semantics<parallel>], iteration_bounds = array<i64: 2>, scalar_prefetch = 0 : i64, scratch_operands = 0 : i64, tpu.core_type = #tpu.core_type<tc>, window_params = [{transform_indices = @transform_0, window_bounds = array<i64: 1, 9, 256>}, {transform_indices = @transform_1, window_bounds = array<i64: 1, 8, 256>}, {pipeline_mode = #tpu.pipeline_mode<synchronous>, transform_indices = @transform_2, window_bounds = array<i64: 2, 256>}, {pipeline_mode = #tpu.pipeline_mode<synchronous>, transform_indices = @transform_3, window_bounds = array<i64: 32, 9>}, {pipeline_mode = #tpu.pipeline_mode<synchronous>, transform_indices = @transform_4, window_bounds = array<i64: 8, 144>}, {pipeline_mode = #tpu.pipeline_mode<synchronous>, transform_indices = @transform_5, window_bounds = array<i64: 8, 1>}, {pipeline_mode = #tpu.pipeline_mode<synchronous>, transform_indices = @transform_6, window_bounds = array<i64: 8, 72>}, {pipeline_mode = #tpu.pipeline_mode<synchronous>, transform_indices = @transform_7, window_bounds = array<i64: 8, 1>}, {transform_indices = @transform_8, window_bounds = array<i64: 1, 8, 256>}]} {
    %c0 = arith.constant 0 : index
    %c0_0 = arith.constant 0 : index
    %c0_1 = arith.constant 0 : index
    %0 = vector.load %arg1[%c0, %c0_0, %c0_1] : memref<1x9x256xf32, #tpu.memory_space<vmem>>, vector<1x9x256xf32>
    %1 = vector.shape_cast %0 : vector<1x9x256xf32> to vector<9x256xf32>
    %c0_2 = arith.constant 0 : index
    %c0_3 = arith.constant 0 : index
    %c0_4 = arith.constant 0 : index
    %2 = vector.load %arg2[%c0_2, %c0_3, %c0_4] : memref<1x8x256xf32, #tpu.memory_space<vmem>>, vector<1x8x256xf32>
    %3 = vector.shape_cast %2 : vector<1x8x256xf32> to vector<8x256xf32>
    %c0_5 = arith.constant 0 : index
    %c0_6 = arith.constant 0 : index
    %4 = vector.load %arg3[%c0_5, %c0_6] : memref<2x256xi32, #tpu.memory_space<vmem>>, vector<1x256xi32>
    %c1 = arith.constant 1 : index
    %c0_7 = arith.constant 0 : index
    %5 = vector.load %arg3[%c1, %c0_7] : memref<2x256xi32, #tpu.memory_space<vmem>>, vector<1x256xi32>
    %c0_8 = arith.constant 0 : index
    %c0_9 = arith.constant 0 : index
    %6 = vector.load %arg4[%c0_8, %c0_9] : memref<32x9xf32, #tpu.memory_space<vmem>>, vector<32x9xf32>
    %cst = arith.constant dense<0.000000e+00> : vector<32x256xf32>
    %7 = tpu.matmul %6, %1, %cst {dimension_numbers = #tpu.dot_dimension_numbers<[1], [0], [0], [1], [0, 0, 1, 1], [], []>} : vector<32x9xf32>, vector<9x256xf32>, vector<32x256xf32> -> vector<32x256xf32>
    %c0_i32 = arith.constant 0 : i32
    %8 = vector.broadcast %c0_i32 : i32 to vector<1x256xi32>
    %9 = arith.cmpi sge, %4, %8 : vector<1x256xi32>
    %c16_i32 = arith.constant 16 : i32
    %10 = vector.broadcast %c16_i32 : i32 to vector<1x256xi32>
    %11 = arith.cmpi slt, %4, %10 : vector<1x256xi32>
    %12 = arith.andi %9, %11 : vector<1x256xi1>
    %c0_i32_10 = arith.constant 0 : i32
    %13 = vector.broadcast %c0_i32_10 : i32 to vector<1x256xi32>
    %14 = arith.cmpi sge, %5, %13 : vector<1x256xi32>
    %c16_i32_11 = arith.constant 16 : i32
    %15 = vector.broadcast %c16_i32_11 : i32 to vector<1x256xi32>
    %16 = arith.cmpi slt, %5, %15 : vector<1x256xi32>
    %17 = arith.andi %14, %16 : vector<1x256xi1>
    %c0_i32_12 = arith.constant 0 : i32
    %18 = vector.broadcast %c0_i32_12 : i32 to vector<1x256xi32>
    %19 = arith.subi %4, %18 : vector<1x256xi32>
    %c1_i32 = arith.constant 1 : i32
    %20 = vector.broadcast %c1_i32 : i32 to vector<1x256xi32>
    %21 = arith.andi %19, %20 : vector<1x256xi32>
    %c0_i32_13 = arith.constant 0 : i32
    %22 = vector.broadcast %c0_i32_13 : i32 to vector<1x256xi32>
    %23 = arith.cmpi eq, %21, %22 : vector<1x256xi32>
    %24 = arith.andi %12, %23 : vector<1x256xi1>
    %c0_i32_14 = arith.constant 0 : i32
    %25 = vector.broadcast %c0_i32_14 : i32 to vector<1x256xi32>
    %26 = arith.subi %4, %25 : vector<1x256xi32>
    %c1_i32_15 = arith.constant 1 : i32
    %27 = vector.broadcast %c1_i32_15 : i32 to vector<1x256xi32>
    %28 = arith.andi %26, %27 : vector<1x256xi32>
    %c1_i32_16 = arith.constant 1 : i32
    %29 = vector.broadcast %c1_i32_16 : i32 to vector<1x256xi32>
    %30 = arith.cmpi eq, %28, %29 : vector<1x256xi32>
    %31 = arith.andi %12, %30 : vector<1x256xi1>
    %c0_i32_17 = arith.constant 0 : i32
    %32 = vector.broadcast %c0_i32_17 : i32 to vector<1x256xi32>
    %33 = arith.subi %5, %32 : vector<1x256xi32>
    %c1_i32_18 = arith.constant 1 : i32
    %34 = vector.broadcast %c1_i32_18 : i32 to vector<1x256xi32>
    %35 = arith.andi %33, %34 : vector<1x256xi32>
    %c0_i32_19 = arith.constant 0 : i32
    %36 = vector.broadcast %c0_i32_19 : i32 to vector<1x256xi32>
    %37 = arith.cmpi eq, %35, %36 : vector<1x256xi32>
    %38 = arith.andi %17, %37 : vector<1x256xi1>
    %c0_i32_20 = arith.constant 0 : i32
    %39 = vector.broadcast %c0_i32_20 : i32 to vector<1x256xi32>
    %40 = arith.subi %5, %39 : vector<1x256xi32>
    %c1_i32_21 = arith.constant 1 : i32
    %41 = vector.broadcast %c1_i32_21 : i32 to vector<1x256xi32>
    %42 = arith.andi %40, %41 : vector<1x256xi32>
    %c1_i32_22 = arith.constant 1 : i32
    %43 = vector.broadcast %c1_i32_22 : i32 to vector<1x256xi32>
    %44 = arith.cmpi eq, %42, %43 : vector<1x256xi32>
    %45 = arith.andi %17, %44 : vector<1x256xi1>
    %46 = arith.andi %24, %38 : vector<1x256xi1>
    %cst_23 = arith.constant 1.000000e+00 : f32
    %cst_24 = arith.constant 0.000000e+00 : f32
    %47 = vector.broadcast %cst_23 : f32 to vector<1x256xf32>
    %48 = vector.broadcast %cst_24 : f32 to vector<1x256xf32>
    %49 = arith.select %46, %47, %48 : vector<1x256xi1>, vector<1x256xf32>
    %50 = vector.extract_strided_slice %7 {offsets = [0, 0], sizes = [8, 256], strides = [1, 1]} : vector<32x256xf32> to vector<8x256xf32>
    %51 = vector.broadcast %49 : vector<1x256xf32> to vector<8x256xf32>
    %52 = arith.mulf %51, %50 : vector<8x256xf32>
    %53 = arith.andi %24, %45 : vector<1x256xi1>
    %cst_25 = arith.constant 1.000000e+00 : f32
    %cst_26 = arith.constant 0.000000e+00 : f32
    %54 = vector.broadcast %cst_25 : f32 to vector<1x256xf32>
    %55 = vector.broadcast %cst_26 : f32 to vector<1x256xf32>
    %56 = arith.select %53, %54, %55 : vector<1x256xi1>, vector<1x256xf32>
    %57 = vector.extract_strided_slice %7 {offsets = [8, 0], sizes = [8, 256], strides = [1, 1]} : vector<32x256xf32> to vector<8x256xf32>
    %58 = vector.broadcast %56 : vector<1x256xf32> to vector<8x256xf32>
    %59 = arith.mulf %58, %57 : vector<8x256xf32>
    %60 = arith.addf %52, %59 : vector<8x256xf32>
    %61 = arith.andi %31, %38 : vector<1x256xi1>
    %cst_27 = arith.constant 1.000000e+00 : f32
    %cst_28 = arith.constant 0.000000e+00 : f32
    %62 = vector.broadcast %cst_27 : f32 to vector<1x256xf32>
    %63 = vector.broadcast %cst_28 : f32 to vector<1x256xf32>
    %64 = arith.select %61, %62, %63 : vector<1x256xi1>, vector<1x256xf32>
    %65 = vector.extract_strided_slice %7 {offsets = [16, 0], sizes = [8, 256], strides = [1, 1]} : vector<32x256xf32> to vector<8x256xf32>
    %66 = vector.broadcast %64 : vector<1x256xf32> to vector<8x256xf32>
    %67 = arith.mulf %66, %65 : vector<8x256xf32>
    %68 = arith.addf %60, %67 : vector<8x256xf32>
    %69 = arith.andi %31, %45 : vector<1x256xi1>
    %cst_29 = arith.constant 1.000000e+00 : f32
    %cst_30 = arith.constant 0.000000e+00 : f32
    %70 = vector.broadcast %cst_29 : f32 to vector<1x256xf32>
    %71 = vector.broadcast %cst_30 : f32 to vector<1x256xf32>
    %72 = arith.select %69, %70, %71 : vector<1x256xi1>, vector<1x256xf32>
    %73 = vector.extract_strided_slice %7 {offsets = [24, 0], sizes = [8, 256], strides = [1, 1]} : vector<32x256xf32> to vector<8x256xf32>
    %74 = vector.broadcast %72 : vector<1x256xf32> to vector<8x256xf32>
    %75 = arith.mulf %74, %73 : vector<8x256xf32>
    %76 = arith.addf %68, %75 : vector<8x256xf32>
    %77 = tpu.concatenate %3, %76 in 0 : vector<8x256xf32>, vector<8x256xf32> -> vector<16x256xf32>
    %c1_i32_31 = arith.constant 1 : i32
    %78 = vector.broadcast %c1_i32_31 : i32 to vector<1x256xi32>
    %79 = arith.cmpi sge, %4, %78 : vector<1x256xi32>
    %c1_i32_32 = arith.constant 1 : i32
    %80 = vector.broadcast %c1_i32_32 : i32 to vector<1x256xi32>
    %81 = arith.cmpi sge, %5, %80 : vector<1x256xi32>
    %82 = arith.andi %79, %81 : vector<1x256xi1>
    %cst_33 = arith.constant 1.000000e+00 : f32
    %cst_34 = arith.constant 0.000000e+00 : f32
    %83 = vector.broadcast %cst_33 : f32 to vector<1x256xf32>
    %84 = vector.broadcast %cst_34 : f32 to vector<1x256xf32>
    %85 = arith.select %82, %83, %84 : vector<1x256xi1>, vector<1x256xf32>
    %c1_i32_35 = arith.constant 1 : i32
    %86 = vector.broadcast %c1_i32_35 : i32 to vector<1x256xi32>
    %87 = arith.cmpi sge, %4, %86 : vector<1x256xi32>
    %cst_36 = arith.constant 1.000000e+00 : f32
    %cst_37 = arith.constant 0.000000e+00 : f32
    %88 = vector.broadcast %cst_36 : f32 to vector<1x256xf32>
    %89 = vector.broadcast %cst_37 : f32 to vector<1x256xf32>
    %90 = arith.select %87, %88, %89 : vector<1x256xi1>, vector<1x256xf32>
    %c1_i32_38 = arith.constant 1 : i32
    %91 = vector.broadcast %c1_i32_38 : i32 to vector<1x256xi32>
    %92 = arith.cmpi sge, %4, %91 : vector<1x256xi32>
    %c15_i32 = arith.constant 15 : i32
    %93 = vector.broadcast %c15_i32 : i32 to vector<1x256xi32>
    %94 = arith.cmpi slt, %5, %93 : vector<1x256xi32>
    %95 = arith.andi %92, %94 : vector<1x256xi1>
    %cst_39 = arith.constant 1.000000e+00 : f32
    %cst_40 = arith.constant 0.000000e+00 : f32
    %96 = vector.broadcast %cst_39 : f32 to vector<1x256xf32>
    %97 = vector.broadcast %cst_40 : f32 to vector<1x256xf32>
    %98 = arith.select %95, %96, %97 : vector<1x256xi1>, vector<1x256xf32>
    %c1_i32_41 = arith.constant 1 : i32
    %99 = vector.broadcast %c1_i32_41 : i32 to vector<1x256xi32>
    %100 = arith.cmpi sge, %5, %99 : vector<1x256xi32>
    %cst_42 = arith.constant 1.000000e+00 : f32
    %cst_43 = arith.constant 0.000000e+00 : f32
    %101 = vector.broadcast %cst_42 : f32 to vector<1x256xf32>
    %102 = vector.broadcast %cst_43 : f32 to vector<1x256xf32>
    %103 = arith.select %100, %101, %102 : vector<1x256xi1>, vector<1x256xf32>
    %c15_i32_44 = arith.constant 15 : i32
    %104 = vector.broadcast %c15_i32_44 : i32 to vector<1x256xi32>
    %105 = arith.cmpi slt, %5, %104 : vector<1x256xi32>
    %cst_45 = arith.constant 1.000000e+00 : f32
    %cst_46 = arith.constant 0.000000e+00 : f32
    %106 = vector.broadcast %cst_45 : f32 to vector<1x256xf32>
    %107 = vector.broadcast %cst_46 : f32 to vector<1x256xf32>
    %108 = arith.select %105, %106, %107 : vector<1x256xi1>, vector<1x256xf32>
    %c15_i32_47 = arith.constant 15 : i32
    %109 = vector.broadcast %c15_i32_47 : i32 to vector<1x256xi32>
    %110 = arith.cmpi slt, %4, %109 : vector<1x256xi32>
    %c1_i32_48 = arith.constant 1 : i32
    %111 = vector.broadcast %c1_i32_48 : i32 to vector<1x256xi32>
    %112 = arith.cmpi sge, %5, %111 : vector<1x256xi32>
    %113 = arith.andi %110, %112 : vector<1x256xi1>
    %cst_49 = arith.constant 1.000000e+00 : f32
    %cst_50 = arith.constant 0.000000e+00 : f32
    %114 = vector.broadcast %cst_49 : f32 to vector<1x256xf32>
    %115 = vector.broadcast %cst_50 : f32 to vector<1x256xf32>
    %116 = arith.select %113, %114, %115 : vector<1x256xi1>, vector<1x256xf32>
    %c15_i32_51 = arith.constant 15 : i32
    %117 = vector.broadcast %c15_i32_51 : i32 to vector<1x256xi32>
    %118 = arith.cmpi slt, %4, %117 : vector<1x256xi32>
    %cst_52 = arith.constant 1.000000e+00 : f32
    %cst_53 = arith.constant 0.000000e+00 : f32
    %119 = vector.broadcast %cst_52 : f32 to vector<1x256xf32>
    %120 = vector.broadcast %cst_53 : f32 to vector<1x256xf32>
    %121 = arith.select %118, %119, %120 : vector<1x256xi1>, vector<1x256xf32>
    %c15_i32_54 = arith.constant 15 : i32
    %122 = vector.broadcast %c15_i32_54 : i32 to vector<1x256xi32>
    %123 = arith.cmpi slt, %4, %122 : vector<1x256xi32>
    %c15_i32_55 = arith.constant 15 : i32
    %124 = vector.broadcast %c15_i32_55 : i32 to vector<1x256xi32>
    %125 = arith.cmpi slt, %5, %124 : vector<1x256xi32>
    %126 = arith.andi %123, %125 : vector<1x256xi1>
    %cst_56 = arith.constant 1.000000e+00 : f32
    %cst_57 = arith.constant 0.000000e+00 : f32
    %127 = vector.broadcast %cst_56 : f32 to vector<1x256xf32>
    %128 = vector.broadcast %cst_57 : f32 to vector<1x256xf32>
    %129 = arith.select %126, %127, %128 : vector<1x256xi1>, vector<1x256xf32>
    %c17_i32 = arith.constant 17 : i32
    %130 = tpu.dynamic_rotate %77 by %c17_i32 dim 1 : vector<16x256xf32>, i32 -> vector<16x256xf32>
    %131 = vector.broadcast %85 : vector<1x256xf32> to vector<16x256xf32>
    %132 = arith.mulf %130, %131 : vector<16x256xf32>
    %c16_i32_58 = arith.constant 16 : i32
    %133 = tpu.dynamic_rotate %77 by %c16_i32_58 dim 1 : vector<16x256xf32>, i32 -> vector<16x256xf32>
    %134 = vector.broadcast %90 : vector<1x256xf32> to vector<16x256xf32>
    %135 = arith.mulf %133, %134 : vector<16x256xf32>
    %c15_i32_59 = arith.constant 15 : i32
    %136 = tpu.dynamic_rotate %77 by %c15_i32_59 dim 1 : vector<16x256xf32>, i32 -> vector<16x256xf32>
    %137 = vector.broadcast %98 : vector<1x256xf32> to vector<16x256xf32>
    %138 = arith.mulf %136, %137 : vector<16x256xf32>
    %c1_i32_60 = arith.constant 1 : i32
    %139 = tpu.dynamic_rotate %77 by %c1_i32_60 dim 1 : vector<16x256xf32>, i32 -> vector<16x256xf32>
    %140 = vector.broadcast %103 : vector<1x256xf32> to vector<16x256xf32>
    %141 = arith.mulf %139, %140 : vector<16x256xf32>
    %c255_i32 = arith.constant 255 : i32
    %142 = tpu.dynamic_rotate %77 by %c255_i32 dim 1 : vector<16x256xf32>, i32 -> vector<16x256xf32>
    %143 = vector.broadcast %108 : vector<1x256xf32> to vector<16x256xf32>
    %144 = arith.mulf %142, %143 : vector<16x256xf32>
    %c241_i32 = arith.constant 241 : i32
    %145 = tpu.dynamic_rotate %77 by %c241_i32 dim 1 : vector<16x256xf32>, i32 -> vector<16x256xf32>
    %146 = vector.broadcast %116 : vector<1x256xf32> to vector<16x256xf32>
    %147 = arith.mulf %145, %146 : vector<16x256xf32>
    %c240_i32 = arith.constant 240 : i32
    %148 = tpu.dynamic_rotate %77 by %c240_i32 dim 1 : vector<16x256xf32>, i32 -> vector<16x256xf32>
    %149 = vector.broadcast %121 : vector<1x256xf32> to vector<16x256xf32>
    %150 = arith.mulf %148, %149 : vector<16x256xf32>
    %c239_i32 = arith.constant 239 : i32
    %151 = tpu.dynamic_rotate %77 by %c239_i32 dim 1 : vector<16x256xf32>, i32 -> vector<16x256xf32>
    %152 = vector.broadcast %129 : vector<1x256xf32> to vector<16x256xf32>
    %153 = arith.mulf %151, %152 : vector<16x256xf32>
    %154 = tpu.concatenate %132, %135, %138, %141, %77, %144, %147, %150, %153 in 0 : vector<16x256xf32>, vector<16x256xf32>, vector<16x256xf32>, vector<16x256xf32>, vector<16x256xf32>, vector<16x256xf32>, vector<16x256xf32>, vector<16x256xf32>, vector<16x256xf32> -> vector<144x256xf32>
    %c0_61 = arith.constant 0 : index
    %c0_62 = arith.constant 0 : index
    %155 = vector.load %arg5[%c0_61, %c0_62] : memref<8x144xf32, #tpu.memory_space<vmem>>, vector<8x144xf32>
    %cst_63 = arith.constant dense<0.000000e+00> : vector<8x256xf32>
    %156 = tpu.matmul %155, %154, %cst_63 {dimension_numbers = #tpu.dot_dimension_numbers<[1], [0], [0], [1], [0, 0, 1, 1], [], []>} : vector<8x144xf32>, vector<144x256xf32>, vector<8x256xf32> -> vector<8x256xf32>
    %c0_64 = arith.constant 0 : index
    %c0_65 = arith.constant 0 : index
    %157 = vector.load %arg6[%c0_64, %c0_65] : memref<8x1xf32, #tpu.memory_space<vmem>>, vector<8x1xf32>
    %158 = vector.broadcast %157 : vector<8x1xf32> to vector<8x256xf32>
    %159 = arith.addf %156, %158 : vector<8x256xf32>
    %cst_66 = arith.constant 0.000000e+00 : f32
    %160 = vector.broadcast %cst_66 : f32 to vector<8x256xf32>
    %161 = arith.maximumf %159, %160 : vector<8x256xf32>
    %c17_i32_67 = arith.constant 17 : i32
    %162 = tpu.dynamic_rotate %161 by %c17_i32_67 dim 1 : vector<8x256xf32>, i32 -> vector<8x256xf32>
    %163 = vector.broadcast %85 : vector<1x256xf32> to vector<8x256xf32>
    %164 = arith.mulf %162, %163 : vector<8x256xf32>
    %c16_i32_68 = arith.constant 16 : i32
    %165 = tpu.dynamic_rotate %161 by %c16_i32_68 dim 1 : vector<8x256xf32>, i32 -> vector<8x256xf32>
    %166 = vector.broadcast %90 : vector<1x256xf32> to vector<8x256xf32>
    %167 = arith.mulf %165, %166 : vector<8x256xf32>
    %c15_i32_69 = arith.constant 15 : i32
    %168 = tpu.dynamic_rotate %161 by %c15_i32_69 dim 1 : vector<8x256xf32>, i32 -> vector<8x256xf32>
    %169 = vector.broadcast %98 : vector<1x256xf32> to vector<8x256xf32>
    %170 = arith.mulf %168, %169 : vector<8x256xf32>
    %c1_i32_70 = arith.constant 1 : i32
    %171 = tpu.dynamic_rotate %161 by %c1_i32_70 dim 1 : vector<8x256xf32>, i32 -> vector<8x256xf32>
    %172 = vector.broadcast %103 : vector<1x256xf32> to vector<8x256xf32>
    %173 = arith.mulf %171, %172 : vector<8x256xf32>
    %c255_i32_71 = arith.constant 255 : i32
    %174 = tpu.dynamic_rotate %161 by %c255_i32_71 dim 1 : vector<8x256xf32>, i32 -> vector<8x256xf32>
    %175 = vector.broadcast %108 : vector<1x256xf32> to vector<8x256xf32>
    %176 = arith.mulf %174, %175 : vector<8x256xf32>
    %c241_i32_72 = arith.constant 241 : i32
    %177 = tpu.dynamic_rotate %161 by %c241_i32_72 dim 1 : vector<8x256xf32>, i32 -> vector<8x256xf32>
    %178 = vector.broadcast %116 : vector<1x256xf32> to vector<8x256xf32>
    %179 = arith.mulf %177, %178 : vector<8x256xf32>
    %c240_i32_73 = arith.constant 240 : i32
    %180 = tpu.dynamic_rotate %161 by %c240_i32_73 dim 1 : vector<8x256xf32>, i32 -> vector<8x256xf32>
    %181 = vector.broadcast %121 : vector<1x256xf32> to vector<8x256xf32>
    %182 = arith.mulf %180, %181 : vector<8x256xf32>
    %c239_i32_74 = arith.constant 239 : i32
    %183 = tpu.dynamic_rotate %161 by %c239_i32_74 dim 1 : vector<8x256xf32>, i32 -> vector<8x256xf32>
    %184 = vector.broadcast %129 : vector<1x256xf32> to vector<8x256xf32>
    %185 = arith.mulf %183, %184 : vector<8x256xf32>
    %186 = tpu.concatenate %164, %167, %170, %173, %161, %176, %179, %182, %185 in 0 : vector<8x256xf32>, vector<8x256xf32>, vector<8x256xf32>, vector<8x256xf32>, vector<8x256xf32>, vector<8x256xf32>, vector<8x256xf32>, vector<8x256xf32>, vector<8x256xf32> -> vector<72x256xf32>
    %c0_75 = arith.constant 0 : index
    %c0_76 = arith.constant 0 : index
    %187 = vector.load %arg7[%c0_75, %c0_76] : memref<8x72xf32, #tpu.memory_space<vmem>>, vector<8x72xf32>
    %cst_77 = arith.constant dense<0.000000e+00> : vector<8x256xf32>
    %188 = tpu.matmul %187, %186, %cst_77 {dimension_numbers = #tpu.dot_dimension_numbers<[1], [0], [0], [1], [0, 0, 1, 1], [], []>} : vector<8x72xf32>, vector<72x256xf32>, vector<8x256xf32> -> vector<8x256xf32>
    %c0_78 = arith.constant 0 : index
    %c0_79 = arith.constant 0 : index
    %189 = vector.load %arg8[%c0_78, %c0_79] : memref<8x1xf32, #tpu.memory_space<vmem>>, vector<8x1xf32>
    %190 = vector.broadcast %189 : vector<8x1xf32> to vector<8x256xf32>
    %191 = arith.addf %188, %190 : vector<8x256xf32>
    %cst_80 = arith.constant 0.000000e+00 : f32
    %192 = vector.broadcast %cst_80 : f32 to vector<8x256xf32>
    %193 = arith.maximumf %191, %192 : vector<8x256xf32>
    %c0_81 = arith.constant 0 : index
    %c0_82 = arith.constant 0 : index
    %c0_83 = arith.constant 0 : index
    %194 = vector.load %arg9[%c0_81, %c0_82, %c0_83] : memref<1x8x256xf32, #tpu.memory_space<vmem>>, vector<1x8x256xf32>
    %195 = vector.shape_cast %194 : vector<1x8x256xf32> to vector<8x256xf32>
    %196 = vector.shape_cast %193 : vector<8x256xf32> to vector<1x8x256xf32>
    tpu.vector_store %arg9[%c0_81, %c0_82, %c0_83], %196 {strides = array<i32>} : memref<1x8x256xf32, #tpu.memory_space<vmem>>, vector<1x8x256xf32>,
    return
  }
  func.func @transform_0(%arg0: i32) -> (i32, i32, i32) {
    %c0_i32 = arith.constant 0 : i32
    %c0_i32_0 = arith.constant 0 : i32
    %c0_i32_1 = arith.constant 0 : i32
    return %arg0, %c0_i32, %c0_i32_0 : i32, i32, i32
  }
  func.func @transform_1(%arg0: i32) -> (i32, i32, i32) {
    %c0_i32 = arith.constant 0 : i32
    %c0_i32_0 = arith.constant 0 : i32
    %c0_i32_1 = arith.constant 0 : i32
    return %arg0, %c0_i32, %c0_i32_0 : i32, i32, i32
  }
  func.func @transform_2(%arg0: i32) -> (i32, i32) {
    %c0_i32 = arith.constant 0 : i32
    %c0_i32_0 = arith.constant 0 : i32
    %c0_i32_1 = arith.constant 0 : i32
    return %c0_i32, %c0_i32_0 : i32, i32
  }
  func.func @transform_3(%arg0: i32) -> (i32, i32) {
    %c0_i32 = arith.constant 0 : i32
    %c0_i32_0 = arith.constant 0 : i32
    %c0_i32_1 = arith.constant 0 : i32
    return %c0_i32, %c0_i32_0 : i32, i32
  }
  func.func @transform_4(%arg0: i32) -> (i32, i32) {
    %c0_i32 = arith.constant 0 : i32
    %c0_i32_0 = arith.constant 0 : i32
    %c0_i32_1 = arith.constant 0 : i32
    return %c0_i32, %c0_i32_0 : i32, i32
  }
  func.func @transform_5(%arg0: i32) -> (i32, i32) {
    %c0_i32 = arith.constant 0 : i32
    %c0_i32_0 = arith.constant 0 : i32
    %c0_i32_1 = arith.constant 0 : i32
    return %c0_i32, %c0_i32_0 : i32, i32
  }
  func.func @transform_6(%arg0: i32) -> (i32, i32) {
    %c0_i32 = arith.constant 0 : i32
    %c0_i32_0 = arith.constant 0 : i32
    %c0_i32_1 = arith.constant 0 : i32
    return %c0_i32, %c0_i32_0 : i32, i32
  }
  func.func @transform_7(%arg0: i32) -> (i32, i32) {
    %c0_i32 = arith.constant 0 : i32
    %c0_i32_0 = arith.constant 0 : i32
    %c0_i32_1 = arith.constant 0 : i32
    return %c0_i32, %c0_i32_0 : i32, i32
  }
  func.func @transform_8(%arg0: i32) -> (i32, i32, i32) {
    %c0_i32 = arith.constant 0 : i32
    %c0_i32_0 = arith.constant 0 : i32
    %c0_i32_1 = arith.constant 0 : i32
    return %arg0, %c0_i32, %c0_i32_0 : i32, i32, i32
  }
}

</mosaic_0001>

<bundles_post_ra>
// kernel: up_pallas.1
= control target key start
LH: loop header
LB: loop body
LE: loop exit
PB: predicated region body
PF: predicated region fallthrough
CT: control target
= control target key end

     0   :  { %s1241_s27 = smov 0   ;;  %s1762_s0 = inlined_call_operand.vmem [shape: f32[2,9,256], index: 0, kind: input, shape index: {}]   ;;  %s1763_s1 = inlined_call_operand.vmem [shape: f32[2,8,256], index: 1, kind: input, shape index: {}]   ;;  %s1764_s2 = inlined_call_operand.vmem [shape: s32[2,256], index: 2, kind: input, shape index: {}]   ;;  %s1765_s3 = inlined_call_operand.vmem [shape: f32[32,9], index: 3, kind: input, shape index: {}]   ;;  %s1766_s4 = inlined_call_operand.vmem [shape: f32[8,144], index: 4, kind: input, shape index: {}]   ;;  %s1767_s5 = inlined_call_operand.vmem [shape: f32[8,1], index: 5, kind: input, shape index: {}]   ;;  %s1768_s6 = inlined_call_operand.vmem [shape: f32[8,72], index: 6, kind: input, shape index: {}]   ;;  %s1769_s7 = inlined_call_operand.vmem [shape: f32[8,1], index: 7, kind: input, shape index: {}]   ;;  %s1770_s8 = inlined_call_operand.vmem [shape: f32[2,8,256], index: 8, kind: output, shape index: {}]  }
   0x1 LB: > { %s1074_s28 = sadd.s32 4294967295, %s1183_s27   ;;  %p1078_p0 = scmp.ge.s32.totalorder %s1183_s27, 1  ;;  %s1183_s27 = sphi %s1241_s27, %s18_s27  }
   0x2   : > { %p272_p1 = scmp.lt.s32.totalorder %s1183_s27, 3 }
   0x4   : > { %p273_p2 = pnand %p1078_p0, %p272_p1 }
   0x5   : > { %p311_p3 = scmp.lt.s32.totalorder (!%p273_p2), %s1074_s28, 1  ;;  %v1185_v0 = vmov (!%p273_p2), 0.0   ;;  %vm352_vm0 = vcmask (!%p273_p2), 1040384   ;;  %vm1186_vm1 = vmmov (!%p273_p2), 1   ;;  %s1187_s15 = smov (!%p273_p2), 17   ;;  %v335_v9 = vld [vmem:[%s1765_s3] sm:$0xff] (!%p273_p2)  ;;  %v467_v20 = vlaneseq (!%p273_p2) }
   0x6   : > { %276 = sbr.rel (%p273_p2) target bundleno = 1019 (0x3fb), region = 52  ;;  %423 = vmatprep.mubr.f32.mxu0 (!%p273_p2), %v1185_v0  ;;  %vm1100_vm2 = vmpackc.low (!%p273_p2), %vm352_vm0, %vm1186_vm1  ;;  %vm339_vm3 = vcmask (!%p273_p2), 72704   ;;  %s1188_s18 = smov (!%p273_p2), 16   ;;  %v336_v10 = vld [vmem:[%s1765_s3 + $0x8] sm:$0xff] (!%p273_p2)  ;;  %v337_v11 = vld [vmem:[%s1765_s3 + $0x10] sm:$0xff] (!%p273_p2)  ;;  %v1195_v62 = vmov (!%p273_p2), 0  }
   0x7   : > { %v338_v12 = vld [vmem:[%s1765_s3 + $0x18] sm:$0xff] (!%p273_p2)  ;;  %s1189_s25 = smov (!%p273_p2), 15   ;;  %s1190_s26 = smov (!%p273_p2), 1   ;;  %v1301_v13 = vld [vmem:[%s1764_s2] ss:$2 sm:$0x3] (!%p273_p2)  ;;  %1176 = vset.pattern.permute.xlu0 (!%p273_p2), %v1195_v62 }
   0x8   : > { %v1306_v14 = vld [vmem:[%s1764_s2 + $0x1] ss:$2 sm:$0x3] (!%p273_p2)  ;;  %v454_v15 = vand.u32 (!%p273_p2), 1, %v1301_v13  ;;  %vm448_vm4 = vcmp.ge.s32.totalorder (!%p273_p2), %v1301_v13, 0  ;;  %vm449_vm5 = vcmp.lt.s32.totalorder (!%p273_p2), %v1301_v13, 16 }
   0x9   : > { %v459_v16 = vand.u32 (!%p273_p2), 1, %v1306_v14  ;;  %vm451_vm6 = vcmp.ge.s32.totalorder (!%p273_p2), %v1306_v14, 0  ;;  %vm452_vm7 = vcmp.lt.s32.totalorder (!%p273_p2), %v1306_v14, 16  ;;  %vm1314_vm8 = vmand (!%p273_p2), %vm448_vm4, %vm449_vm5  ;;  %v468_v22 = vshrl.u32 (!%p273_p2), %v467_v20, 7  ;;  %s1191_s12 = smov (!%p273_p2), 127   ;;  %s1192_s13 = smov (!%p273_p2), 113  }
   0xa   : > { %vm455_vm9 = vcmp.eq.s32.totalorder (!%p273_p2), %v454_v15, 0  ;;  %vm1318_vm10 = vmand (!%p273_p2), %vm451_vm6, %vm452_vm7  ;;  %vm1341_vm0 = vcmp.eq.s32.totalorder (!%p273_p2), %v454_v15, 1  ;;  %s1194_s16 = smov (!%p273_p2), 111   ;;  %v773_v60 = vld [vmem:[%s1766_s4 + $0x8] sm:$0xff] (!%p273_p2)  ;;  %vm780_vm6 = vcmask (!%p273_p2), 130048   ;;  %v774_v61 = vld [vmem:[%s1767_s5] sm:$0xff] (!%p273_p2) }
   0xb   : > { %vm1322_vm11 = vcmp.eq.s32.totalorder (!%p273_p2), %v459_v16, 0  ;;  %vm1326_vm12 = vcmp.eq.s32.totalorder (!%p273_p2), %v459_v16, 1  ;;  %vm456_vm13 = vmand (!%p273_p2), %vm1314_vm8, %vm455_vm9  ;;  %v1354_v24 = vsub.s32 (!%p273_p2), 0, %v468_v22  ;;  %v1357_v26 = vsub.s32 (!%p273_p2), 1, %v468_v22  ;;  %1092 = vmatprep.mubr.msk.f32.mxu1 (!%p273_p2), %vm780_vm6, %v773_v60 }
   0xc   : > { %vm461_vm14 = vmand (!%p273_p2), %vm1318_vm10, %vm1322_vm11  ;;  %vm530_vm7 = vcmp.ge.s32.totalorder (!%p273_p2), %v1301_v13, 1  ;;  %v1446_v18 = vand.u32 (!%p273_p2), 127, %v467_v20 }
   0xd   : > { %s1782_s28 = smov (!%p311_p3, %s1074_s28), 1  ;;  %vm463_vm15 = vmand %vm1318_vm10, %vm1326_vm12  ;;  %vm535_vm10 = vcmp.lt.s32.totalorder %v1306_v14, 15 }
   0xe   : > { %s1096_s29 = sshll.u32 %s1782_s28, 5  ;;  %s1097_s30 = sshll.u32 %s1782_s28, 4  ;;  %vm464_vm1 = vmand %vm456_vm13, %vm461_vm14  ;;  %vm556_vm11 = vcmp.lt.s32.totalorder %v1446_v18, 17  ;;  %vm752_vm6 = vcmp.lt.s32.totalorder %v1446_v18, 111 }
   0xf   : > { %s315_s11 = scalar_lea.vmem %s1762_s0, %s1096_s29  ;;  %s320_s14 = scalar_lea.vmem %s1763_s1, %s1097_s30  ;;  %v465_v25 = vsel %vm464_vm1, 1.0, %v1185_v0  ;;  %vm536_vm12 = vmand %vm530_vm7, %vm535_vm10 }
  0x10   : > { %v327_v1 = vld [vmem:[%s315_s11 + $0x8] sm:$0xff]  ;;  %v329_v2 = vld [vmem:[%s315_s11 + $0x18] sm:$0x1]  ;;  %v1262_v3 = vld [vmem:[%s320_s14] sm:$0xff]  ;;  %v470_v29 = vrot.slane %v465_v25, %v1354_v24  ;;  %v474_v32 = vrot.slane %v465_v25, %v1357_v26  ;;  %v534_v25 = vsel %vm530_vm7, 1.0, %v1185_v0  ;;  %s325_s9 = scalar_lea.vmem %s1770_s8, %s1097_s30 }
  0x11   : > { %v1264_v4 = vld [vmem:[%s320_s14 + $0x8] sm:$0xff]  ;;  %v1099_v5 = vpack.c.bf16 %v329_v2, %v327_v1  ;;  %v326_v6 = vld [vmem:[%s315_s11] sm:$0xff]  ;;  %v328_v7 = vld [vmem:[%s315_s11 + $0x10] sm:$0x1]  ;;  %546 = vrot.lane.b32.xlu0 %v1262_v3, %s1187_s15  ;;  %s1193_s14 = smov 112  }
  0x12   : > { %v1102_v8 = vpack.c.bf16 %v328_v7, %v326_v6  ;;  %550 = vrot.lane.b32.xlu1 %v1264_v4, %s1187_s15 }
  0x13   : > { %1101 = vmatprep.subr.msk.bf16.mxu0 %vm1100_vm2, %v1099_v5 }
  0x14   : > { %1104 = vmatpush1.bf16.msk.msra.mxu0 %vm1100_vm2, %v1102_v8  ;;  %vm479_vm2 = vmand %vm456_vm13, %vm463_vm15  ;;  %vm584_vm13 = vcmp.lt.s32.totalorder %v1446_v18, 16 }
  0x15   : > { %576 = vrot.lane.b32.xlu0 %v1262_v3, %s1188_s18  ;;  %v480_v27 = vsel %vm479_vm2, 1.0, %v1185_v0  ;;  %vm668_vm2 = vcmp.lt.s32.totalorder %v1446_v18, 127 }
  0x16   : > { %v485_v31 = vrot.slane %v480_v27, %v1354_v24  ;;  %v489_v33 = vrot.slane %v480_v27, %v1357_v26 }
  0x17   : > { %1088 = vmatmul.mubr.msk.f32.vlgmr.msra.gmra.mrb[0].mxu0 %vm339_vm3, %v335_v9 }
  0x18   : > { %429 = vmatprep.mubr.f32.mxu0 %v1185_v0 }
  0x19   : > { %580 = vrot.lane.b32.xlu0 %v1264_v4, %s1188_s18 }
  0x1b   : > { %1089 = vmatmul.mubr.msk.f32.gmra.mrb[2].mxu0 %vm339_vm3, %v336_v10 }
  0x1c   : > { %435 = vmatprep.mubr.f32.mxu0 %v1185_v0 }
  0x1d   : > { %604 = vrot.lane.b32.xlu0 %v1262_v3, %s1189_s25 }
  0x1f   : > { %1090 = vmatmul.mubr.msk.f32.gmra.mrb[4].mxu0 %vm339_vm3, %v337_v11 }
  0x20   : > { %441 = vmatprep.mubr.f32.mxu0 %v1185_v0 }
  0x21   : > { %608 = vrot.lane.b32.xlu0 %v1264_v4, %s1189_s25 }
  0x23   : > { %1091 = vmatmul.mubr.msk.f32.gmra.mrb[6].mxu0 %vm339_vm3, %v338_v12  ;;  %vm458_vm3 = vmand %vm1314_vm8, %vm1341_vm0  ;;  %vm531_vm8 = vcmp.ge.s32.totalorder %v1306_v14, 1  ;;  %vm540_vm0 = vcmp.lt.s32.totalorder %v1301_v13, 15 }
  0x24   : > { %996 = vmatprep.mubr.f32.mxu0 %v1185_v0  ;;  %vm496_vm4 = vmand %vm458_vm3, %vm461_vm14  ;;  %vm612_vm14 = vcmp.lt.s32.totalorder %v1446_v18, 15 }
  0x25   : > { %632 = vrot.lane.b32.xlu0 %v1262_v3, %s1190_s26  ;;  %v497_v34 = vsel %vm496_vm4, 1.0, %v1185_v0  ;;  %vm513_vm5 = vmand %vm458_vm3, %vm463_vm15  ;;  %vm640_vm15 = vcmp.lt.s32.totalorder %v1446_v18, 1  ;;  %vm696_vm3 = vcmp.lt.s32.totalorder %v1446_v18, 113 }
  0x26   : > { %v502_v39 = vrot.slane %v497_v34, %v1354_v24  ;;  %v506_v42 = vrot.slane %v497_v34, %v1357_v26  ;;  %v514_v43 = vsel %vm513_vm5, 1.0, %v1185_v0  ;;  %vm532_vm9 = vmand %vm530_vm7, %vm531_vm8  ;;  %v537_v34 = vsel %vm536_vm12, 1.0, %v1185_v0 }
  0x27   : > { %v519_v49 = vrot.slane %v514_v43, %v1354_v24  ;;  %v523_v51 = vrot.slane %v514_v43, %v1357_v26  ;;  %v533_v22 = vsel %vm532_vm9, 1.0, %v1185_v0  ;;  %v538_v43 = vsel %vm531_vm8, 1.0, %v1185_v0  ;;  %vm541_vm1 = vmand %vm540_vm0, %vm531_vm8 }
  0x28   : > { %v1463_v20 = vrot.slane %v533_v22, %v1354_v24  ;;  %v1466_v27 = vrot.slane %v533_v22, %v1357_v26  ;;  %vm544_vm4 = vmand %vm540_vm0, %vm535_vm10  ;;  %vm724_vm5 = vcmp.lt.s32.totalorder %v1446_v18, 112  ;;  %vm928_vm7 = vcmask 588800  }
  0x29   : > { %636 = vrot.lane.b32.xlu0 %v1264_v4, %s1190_s26 }
  0x83   : > { %v547_v63 = vpop.permute.xlu0 %546 }
  0x84   : > { %v551_v8 = vpop.permute.xlu1 %550 }
  0x87   : > { %v577_v1 = vpop.permute.xlu0 %576 }
  0x8b   : > { %v581_v2 = vpop.permute.xlu0 %580 }
  0x8f   : > { %v605_v5 = vpop.permute.xlu0 %604 }
  0x93   : > { %v609_v6 = vpop.permute.xlu0 %608 }
  0x97   : > { %v1433_v7 = vpop.permute.xlu0 %632 }
  0x9b   : > { %v1435_v9 = vpop.permute.xlu0 %636 }
  0xea   : > { %v425_v28 = vpop.f32.mrb[0].mxu0 }
  0xeb   : > { %v427_v30 = vpop.f32.mrb[1].mxu0  ;;  %v477_v36 = vmul.f32 %v470_v29, %v425_v28  ;;  %v557_v29 = vsel %vm556_vm11, %v547_v63, %v551_v8 }
  0xec   : > { %v478_v40 = vmul.f32 %v474_v32, %v427_v30  ;;  %v559_v30 = vsel %vm556_vm11, %v551_v8, %v547_v63  ;;  %v1520_v63 = vrot.slane %v538_v43, %v1354_v24 }
  0xee   : > { %v431_v35 = vpop.f32.mrb[2].mxu0 }
  0xef   : > { %v492_v37 = vmul.f32 %v485_v31, %v431_v35  ;;  %v433_v38 = vpop.f32.mrb[3].mxu0  ;;  %v1476_v31 = vrot.slane %v534_v25, %v1354_v24 }
  0xf0   : > { %v493_v41 = vmul.f32 %v489_v33, %v433_v38  ;;  %v1479_v33 = vrot.slane %v534_v25, %v1357_v26  ;;  %v641_v25 = vsel %vm640_vm15, %v1433_v7, %v1435_v9 }
  0xf1   : > { %v494_v44 = vadd.f32 %v492_v37, %v477_v36  ;;  %v572_v37 = vmul.f32 %v1463_v20, %v559_v30 }
  0xf2   : > { %v495_v45 = vadd.f32 %v493_v41, %v478_v40  ;;  %v437_v46 = vpop.f32.mrb[4].mxu0  ;;  %v585_v41 = vsel %vm584_vm13, %v577_v1, %v581_v2 }
  0xf3   : > { %v509_v47 = vmul.f32 %v502_v39, %v437_v46  ;;  %v439_v48 = vpop.f32.mrb[5].mxu0  ;;  %v573_v39 = vmul.f32 %v1466_v27, %v557_v29 }
  0xf4   : > { %v510_v50 = vmul.f32 %v506_v42, %v439_v48  ;;  %v587_v42 = vsel %vm584_vm13, %v581_v2, %v577_v1  ;;  %v1501_v48 = vrot.slane %v537_v34, %v1354_v24  ;;  %v1523_v1 = vrot.slane %v538_v43, %v1357_v26 }
  0xf5   : > { %v511_v52 = vadd.f32 %v509_v47, %v494_v44 }
  0xf6   : > { %v512_v53 = vadd.f32 %v510_v50, %v495_v45  ;;  %v443_v54 = vpop.f32.mrb[6].mxu0 }
  0xf7   : > { %v526_v55 = vmul.f32 %v519_v49, %v443_v54  ;;  %v445_v56 = vpop.f32.mrb[7].mxu0  ;;  %v1504_v49 = vrot.slane %v537_v34, %v1357_v26 }
  0xf8   : > { %v527_v57 = vmul.f32 %v523_v51, %v445_v56  ;;  %v613_v56 = vsel %vm612_vm14, %v605_v5, %v609_v6 }
  0xf9   : > { %v1375_v58 = vadd.f32 %v526_v55, %v511_v52  ;;  %v600_v52 = vmul.f32 %v1476_v31, %v587_v42  ;;  %v542_v42 = vsel %vm541_vm1, 1.0, %v1185_v0 }
  0xfa   : > { %v1377_v59 = vadd.f32 %v527_v57, %v512_v53  ;;  %v601_v53 = vmul.f32 %v1479_v33, %v585_v41  ;;  %v615_v57 = vsel %vm612_vm14, %v609_v6, %v605_v5  ;;  %v629_v6 = vmul.f32 %v1504_v49, %v613_v56 }
  0xfb   : > { %578 = vrot.lane.b32.xlu1 %v1375_v58, %s1188_s18  ;;  %548 = vrot.lane.b32.xlu0 %v1375_v58, %s1187_s15  ;;  %v628_v5 = vmul.f32 %v1501_v48, %v615_v57 }
  0xff   : > { %606 = vrot.lane.b32.xlu1 %v1375_v58, %s1189_s25  ;;  %660 = vrot.lane.b32.xlu0 %v1262_v3, %s1191_s12 }
 0x103   : > { %634 = vrot.lane.b32.xlu1 %v1375_v58, %s1190_s26  ;;  %664 = vrot.lane.b32.xlu0 %v1264_v4, %s1191_s12 }
 0x107   : > { %662 = vrot.lane.b32.xlu1 %v1375_v58, %s1191_s12  ;;  %688 = vrot.lane.b32.xlu0 %v1262_v3, %s1192_s13 }
 0x10b   : > { %690 = vrot.lane.b32.xlu1 %v1375_v58, %s1192_s13  ;;  %692 = vrot.lane.b32.xlu0 %v1264_v4, %s1192_s13 }
 0x10f   : > { %718 = vrot.lane.b32.xlu1 %v1375_v58, %s1193_s14  ;;  %716 = vrot.lane.b32.xlu0 %v1262_v3, %s1193_s14 }
 0x113   : > { %552 = vrot.lane.b32.xlu1 %v1377_v59, %s1187_s15  ;;  %720 = vrot.lane.b32.xlu0 %v1264_v4, %s1193_s14 }
 0x117   : > { %582 = vrot.lane.b32.xlu1 %v1377_v59, %s1188_s18  ;;  %744 = vrot.lane.b32.xlu0 %v1262_v3, %s1194_s16 }
 0x11b   : > { %610 = vrot.lane.b32.xlu1 %v1377_v59, %s1189_s25  ;;  %748 = vrot.lane.b32.xlu0 %v1264_v4, %s1194_s16 }
 0x11f   : > { %638 = vrot.lane.b32.xlu1 %v1377_v59, %s1190_s26  ;;  %777 = vperm.xlu0 %1176, %v774_v61  }
 0x123   : > { %746 = vrot.lane.b32.xlu1 %v1375_v58, %s1194_s16 }
 0x127   : > { %666 = vrot.lane.b32.xlu1 %v1377_v59, %s1191_s12 }
 0x12b   : > { %694 = vrot.lane.b32.xlu1 %v1377_v59, %s1192_s13 }
 0x12f   : > { %722 = vrot.lane.b32.xlu1 %v1377_v59, %s1193_s14 }
 0x133   : > { %750 = vrot.lane.b32.xlu1 %v1377_v59, %s1194_s16 }
 0x16d   : > { %v579_v10 = vpop.permute.xlu1 %578  ;;  %v549_v12 = vpop.permute.xlu0 %548 }
 0x171   : > { %v607_v11 = vpop.permute.xlu1 %606  ;;  %v1439_v16 = vpop.permute.xlu0 %660 }
 0x175   : > { %v1437_v15 = vpop.permute.xlu1 %634  ;;  %v1452_v21 = vpop.permute.xlu0 %664 }
 0x179   : > { %v1441_v17 = vpop.permute.xlu1 %662  ;;  %v1468_v28 = vpop.permute.xlu0 %688 }
 0x17d   : > { %v1450_v19 = vpop.permute.xlu1 %690  ;;  %v1498_v47 = vpop.permute.xlu0 %692 }
 0x17e   : > { %v697_v57 = vsel %vm696_vm3, %v1468_v28, %v1498_v47 }
 0x181   : > { %v1457_v23 = vpop.permute.xlu1 %718  ;;  %v1533_v22 = vpop.permute.xlu0 %716 }
 0x185   : > { %v553_v32 = vpop.permute.xlu1 %552  ;;  %v721_v41 = vpop.permute.xlu0 %720 }
 0x186   : > { %v558_v35 = vsel %vm556_vm11, %v549_v12, %v553_v32  ;;  %v560_v36 = vsel %vm556_vm11, %v553_v32, %v549_v12 }
 0x187   : > { %v574_v38 = vmul.f32 %v1463_v20, %v560_v36  ;;  %v575_v40 = vmul.f32 %v1466_v27, %v558_v35 }
 0x189   : > { %v583_v44 = vpop.permute.xlu1 %582  ;;  %v1105_v45 = vpack.c.bf16 %v575_v40, %v573_v39  ;;  %v1107_v46 = vpack.c.bf16 %v574_v38, %v572_v37  ;;  %v657_v37 = vmul.f32 %v1523_v1, %v641_v25  ;;  %v539_v38 = vsel %vm535_vm10, 1.0, %v1185_v0  ;;  %v745_v56 = vpop.permute.xlu0 %744 }
 0x18a   : > { %v586_v50 = vsel %vm584_vm13, %v579_v10, %v583_v44  ;;  %v588_v51 = vsel %vm584_vm13, %v583_v44, %v579_v10  ;;  %v1566_v43 = vrot.slane %v539_v38, %v1354_v24  ;;  %v1569_v44 = vrot.slane %v539_v38, %v1357_v26 }
 0x18b   : > { %v602_v54 = vmul.f32 %v1476_v31, %v588_v51  ;;  %v603_v55 = vmul.f32 %v1479_v33, %v586_v50  ;;  %1106 = vmatprep.subr.bf16.mxu1 %v1105_v45  ;;  %v1121_v45 = vpack.c.bf16 %v1377_v59, %v1264_v4  ;;  %v671_v50 = vsel %vm668_vm2, %v1452_v21, %v1439_v16 }
 0x18c   : > { %1108 = vmatpush1.bf16.msra.mxu1 %v1107_v46  ;;  %v669_v46 = vsel %vm668_vm2, %v1439_v16, %v1452_v21  ;;  %v1583_v51 = vrot.slane %v542_v42, %v1354_v24  ;;  %v1123_v4 = vpack.c.bf16 %v1375_v58, %v1262_v3  ;;  %v1588_v59 = vrot.slane %v542_v42, %v1357_v26 }
 0x18d   : > { %v611_v60 = vpop.permute.xlu1 %610  ;;  %v1109_v61 = vpack.c.bf16 %v603_v55, %v601_v53  ;;  %v1111_v62 = vpack.c.bf16 %v602_v54, %v600_v52  ;;  %v543_v53 = vsel %vm540_vm0, 1.0, %v1185_v0  ;;  %v684_v54 = vmul.f32 %v1566_v43, %v669_v46 }
 0x18e   : > { %v614_v2 = vsel %vm612_vm14, %v607_v11, %v611_v60  ;;  %v616_v8 = vsel %vm612_vm14, %v611_v60, %v607_v11  ;;  %v643_v11 = vsel %vm640_vm15, %v1435_v9, %v1433_v7  ;;  %v685_v55 = vmul.f32 %v1569_v44, %v671_v50 }
 0x18f   : > { %v630_v10 = vmul.f32 %v1501_v48, %v616_v8  ;;  %v631_v12 = vmul.f32 %v1504_v49, %v614_v2  ;;  %1110 = vmatprep.subr.bf16.mxu1 %v1109_v61  ;;  %v656_v36 = vmul.f32 %v1520_v63, %v643_v11  ;;  %v1617_v60 = vrot.slane %v543_v53, %v1354_v24 }
 0x190   : > { %1112 = vmatpush1.bf16.msra.mxu1 %v1111_v62  ;;  %v1620_v62 = vrot.slane %v543_v53, %v1357_v26  ;;  %v712_v8 = vmul.f32 %v1583_v51, %v697_v57  ;;  %v727_v25 = vsel %vm724_vm5, %v721_v41, %v1533_v22 }
 0x191   : > { %v639_v29 = vpop.permute.xlu1 %638  ;;  %v1113_v30 = vpack.c.bf16 %v631_v12, %v629_v6  ;;  %v1115_v32 = vpack.c.bf16 %v630_v10, %v628_v5  ;;  %v725_v12 = vsel %vm724_vm5, %v1533_v22, %v721_v41 }
 0x192   : > { %v642_v34 = vsel %vm640_vm15, %v1437_v15, %v639_v29  ;;  %v644_v35 = vsel %vm640_vm15, %v639_v29, %v1437_v15 }
 0x193   : > { %v658_v7 = vmul.f32 %v1520_v63, %v644_v35  ;;  %v659_v9 = vmul.f32 %v1523_v1, %v642_v34  ;;  %1114 = vmatprep.subr.bf16.mxu1 %v1113_v30  ;;  %v740_v35 = vmul.f32 %v1617_v60, %v725_v12 }
 0x194   : > { %1116 = vmatpush1.bf16.msra.mxu1 %v1115_v32 }
 0x195   : > { %v1562_v15 = vpop.permute.xlu1 %746  ;;  %v1117_v39 = vpack.c.bf16 %v659_v9, %v657_v37  ;;  %v1119_v40 = vpack.c.bf16 %v658_v7, %v656_v36  ;;  %v741_v36 = vmul.f32 %v1620_v62, %v727_v25 }
 0x197   : > { %1118 = vmatprep.subr.bf16.mxu1 %v1117_v39 }
 0x198   : > { %1120 = vmatpush1.bf16.msra.mxu1 %v1119_v40 }
 0x199   : > { %v667_v52 = vpop.permute.xlu1 %666  ;;  %1122 = vmatprep.subr.bf16.mxu1 %v1121_v45 }
 0x19a   : > { %v670_v16 = vsel %vm668_vm2, %v1441_v17, %v667_v52  ;;  %v672_v21 = vsel %vm668_vm2, %v667_v52, %v1441_v17  ;;  %v699_v17 = vsel %vm696_vm3, %v1498_v47, %v1468_v28  ;;  %v545_v47 = vsel %vm544_vm4, 1.0, %v1185_v0  ;;  %v749_v0 = vpop.permute.xlu0 %748 }
 0x19b   : > { %v686_v3 = vmul.f32 %v1566_v43, %v670_v16  ;;  %v687_v58 = vmul.f32 %v1569_v44, %v672_v21  ;;  %v713_v5 = vmul.f32 %v1588_v59, %v699_v17  ;;  %v1641_v30 = vrot.slane %v545_v47, %v1354_v24 }
 0x19c   : > { %1124 = vmatpush1.bf16.msra.mxu1 %v1123_v4  ;;  %v1644_v32 = vrot.slane %v545_v47, %v1357_v26  ;;  %v753_v26 = vsel %vm752_vm6, %v745_v56, %v749_v0  ;;  %v755_v7 = vsel %vm752_vm6, %v749_v0, %v745_v56  ;;  %v772_v4 = vld [vmem:[%s1766_s4] sm:$0xff] }
 0x19d   : > { %v695_v14 = vpop.permute.xlu1 %694  ;;  %v1125_v61 = vpack.c.bf16 %v687_v58, %v685_v55  ;;  %v1127_v13 = vpack.c.bf16 %v686_v3, %v684_v54  ;;  %v768_v41 = vmul.f32 %v1641_v30, %v753_v26  ;;  %v922_v58 = vld [vmem:[%s1769_s7] sm:$0xff] }
 0x19e   : > { %v698_v2 = vsel %vm696_vm3, %v1450_v19, %v695_v14  ;;  %v700_v28 = vsel %vm696_vm3, %v695_v14, %v1450_v19  ;;  %v769_v42 = vmul.f32 %v1644_v32, %v755_v7 }
 0x19f   : > { %v714_v6 = vmul.f32 %v1583_v51, %v698_v2  ;;  %v715_v10 = vmul.f32 %v1588_v59, %v700_v28  ;;  %1126 = vmatprep.subr.bf16.mxu1 %v1125_v61 }
 0x1a0   : > { %1128 = vmatpush1.bf16.msra.mxu1 %v1127_v13 }
 0x1a1   : > { %v723_v19 = vpop.permute.xlu1 %722  ;;  %v1129_v11 = vpack.c.bf16 %v715_v10, %v713_v5  ;;  %v1131_v29 = vpack.c.bf16 %v714_v6, %v712_v8 }
 0x1a2   : > { %v726_v34 = vsel %vm724_vm5, %v1457_v23, %v723_v19  ;;  %v728_v22 = vsel %vm724_vm5, %v723_v19, %v1457_v23 }
 0x1a3   : > { %v742_v37 = vmul.f32 %v1617_v60, %v726_v34  ;;  %v743_v24 = vmul.f32 %v1620_v62, %v728_v22  ;;  %1130 = vmatprep.subr.bf16.mxu1 %v1129_v11 }
 0x1a4   : > { %1132 = vmatpush1.bf16.msra.mxu1 %v1131_v29 }
 0x1a5   : > { %v751_v9 = vpop.permute.xlu1 %750  ;;  %v1133_v38 = vpack.c.bf16 %v743_v24, %v741_v36  ;;  %v1135_v39 = vpack.c.bf16 %v742_v37, %v740_v35 }
 0x1a6   : > { %v754_v23 = vsel %vm752_vm6, %v1562_v15, %v751_v9  ;;  %v756_v40 = vsel %vm752_vm6, %v751_v9, %v1562_v15  ;;  %v778_v15 = vpop.permute.xlu0 %777 }
 0x1a7   : > { %v770_v45 = vmul.f32 %v1641_v30, %v754_v23  ;;  %v771_v46 = vmul.f32 %v1644_v32, %v756_v40  ;;  %1134 = vmatprep.subr.bf16.mxu1 %v1133_v38 }
 0x1a8   : > { %1136 = vmatpush1.bf16.msra.mxu1 %v1135_v39 }
 0x1a9   : > { %v1137_v50 = vpack.c.bf16 %v771_v46, %v769_v42  ;;  %v1139_v52 = vpack.c.bf16 %v770_v45, %v768_v41 }
 0x1ab   : > { %1138 = vmatprep.subr.bf16.mxu1 %v1137_v50 }
 0x1ac   : > { %1140 = vmatpush1.bf16.msra.mxu1 %v1139_v52 }
 0x1af   : > { %849 = vmatmul.mubr.f32.vlgmr.msra.gmra.mrb[0].mxu1 %v772_v4 }
 0x282   : > { %v850_v53 = vpop.f32.mrb[0].mxu1 }
 0x283   : > { %v851_v16 = vadd.f32 %v850_v53, %v778_v15  ;;  %v852_v21 = vpop.f32.mrb[1].mxu1 }
 0x284   : > { %v853_v55 = vadd.f32 %v852_v21, %v778_v15 }
 0x285   : > { %v1673_v54 = vmax.f32 %v851_v16, 0.0 }
 0x286   : > { %v856_v3 = vmax.f32 %v853_v55, 0.0 }
 0x287   : > { %865 = vrot.lane.b32.xlu0 %v1673_v54, %s1188_s18  ;;  %857 = vrot.lane.b32.xlu1 %v1673_v54, %s1187_s15 }
 0x28b   : > { %873 = vrot.lane.b32.xlu0 %v1673_v54, %s1189_s25  ;;  %859 = vrot.lane.b32.xlu1 %v856_v3, %s1187_s15 }
 0x28f   : > { %881 = vrot.lane.b32.xlu0 %v1673_v54, %s1190_s26  ;;  %867 = vrot.lane.b32.xlu1 %v856_v3, %s1188_s18 }
 0x293   : > { %889 = vrot.lane.b32.xlu0 %v1673_v54, %s1191_s12  ;;  %875 = vrot.lane.b32.xlu1 %v856_v3, %s1189_s25 }
 0x297   : > { %897 = vrot.lane.b32.xlu0 %v1673_v54, %s1192_s13  ;;  %883 = vrot.lane.b32.xlu1 %v856_v3, %s1190_s26 }
 0x29b   : > { %905 = vrot.lane.b32.xlu0 %v1673_v54, %s1193_s14  ;;  %891 = vrot.lane.b32.xlu1 %v856_v3, %s1191_s12 }
 0x29f   : > { %913 = vrot.lane.b32.xlu0 %v1673_v54, %s1194_s16  ;;  %899 = vrot.lane.b32.xlu1 %v856_v3, %s1192_s13 }
 0x2a3   : > { %925 = vperm.xlu0 %1176, %v922_v58   ;;  %907 = vrot.lane.b32.xlu1 %v856_v3, %s1193_s14 }
 0x2a7   : > { %915 = vrot.lane.b32.xlu1 %v856_v3, %s1194_s16 }
 0x2f9   : > { %v866_v56 = vpop.permute.xlu0 %865  ;;  %v858_v57 = vpop.permute.xlu1 %857 }
 0x2fd   : > { %v874_v17 = vpop.permute.xlu0 %873  ;;  %v860_v14 = vpop.permute.xlu1 %859 }
 0x2fe   : > { %v861_v61 = vsel %vm556_vm11, %v858_v57, %v860_v14  ;;  %v862_v13 = vsel %vm556_vm11, %v860_v14, %v858_v57 }
 0x2ff   : > { %v863_v5 = vmul.f32 %v862_v13, %v1463_v20  ;;  %v864_v6 = vmul.f32 %v861_v61, %v1466_v27 }
 0x301   : > { %v882_v2 = vpop.permute.xlu0 %881  ;;  %v868_v28 = vpop.permute.xlu1 %867 }
 0x302   : > { %v869_v47 = vsel %vm584_vm13, %v866_v56, %v868_v28  ;;  %v870_v8 = vsel %vm584_vm13, %v868_v28, %v866_v56 }
 0x303   : > { %v871_v10 = vmul.f32 %v870_v8, %v1476_v31  ;;  %v872_v12 = vmul.f32 %v869_v47, %v1479_v33 }
 0x305   : > { %v1143_v25 = vpack.c.bf16 %v871_v10, %v863_v5  ;;  %v876_v0 = vpop.permute.xlu1 %875  ;;  %v1141_v19 = vpack.c.bf16 %v872_v12, %v864_v6  ;;  %v890_v11 = vpop.permute.xlu0 %889 }
 0x306   : > { %v877_v29 = vsel %vm612_vm14, %v874_v17, %v876_v0  ;;  %v878_v34 = vsel %vm612_vm14, %v876_v0, %v874_v17 }
 0x307   : > { %1142 = vmatprep.subr.bf16.mxu0 %v1141_v19  ;;  %v879_v31 = vmul.f32 %v878_v34, %v1501_v48  ;;  %v880_v33 = vmul.f32 %v877_v29, %v1504_v49 }
 0x308   : > { %1144 = vmatpush1.bf16.msra.mxu0 %v1143_v25 }
 0x309   : > { %v884_v22 = vpop.permute.xlu1 %883  ;;  %v898_v37 = vpop.permute.xlu0 %897 }
 0x30a   : > { %v885_v20 = vsel %vm640_vm15, %v882_v2, %v884_v22  ;;  %v886_v27 = vsel %vm640_vm15, %v884_v22, %v882_v2 }
 0x30b   : > { %v887_v35 = vmul.f32 %v886_v27, %v1520_v63  ;;  %v888_v36 = vmul.f32 %v885_v20, %v1523_v1 }
 0x30d   : > { %v1147_v24 = vpack.c.bf16 %v887_v35, %v879_v31  ;;  %v892_v26 = vpop.permute.xlu1 %891  ;;  %v1145_v7 = vpack.c.bf16 %v888_v36, %v880_v33  ;;  %v906_v23 = vpop.permute.xlu0 %905 }
 0x30e   : > { %v893_v9 = vsel %vm668_vm2, %v890_v11, %v892_v26  ;;  %v894_v38 = vsel %vm668_vm2, %v892_v26, %v890_v11 }
 0x30f   : > { %v895_v39 = vmul.f32 %v893_v9, %v1566_v43  ;;  %v896_v48 = vmul.f32 %v894_v38, %v1569_v44  ;;  %1146 = vmatprep.subr.bf16.mxu0 %v1145_v7 }
 0x310   : > { %1148 = vmatpush1.bf16.msra.mxu0 %v1147_v24 }
 0x311   : > { %v1151_v49 = vpack.c.bf16 %v895_v39, %v1673_v54  ;;  %v900_v63 = vpop.permute.xlu1 %899  ;;  %v1149_v1 = vpack.c.bf16 %v896_v48, %v856_v3  ;;  %v914_v4 = vpop.permute.xlu0 %913 }
 0x312   : > { %v901_v40 = vsel %vm696_vm3, %v898_v37, %v900_v63  ;;  %v902_v41 = vsel %vm696_vm3, %v900_v63, %v898_v37 }
 0x313   : > { %1150 = vmatprep.subr.bf16.mxu0 %v1149_v1  ;;  %v903_v45 = vmul.f32 %v901_v40, %v1583_v51  ;;  %v904_v46 = vmul.f32 %v902_v41, %v1588_v59  ;;  %v921_v59 = vld [vmem:[%s1768_s6] sm:$0xff] }
 0x314   : > { %1152 = vmatpush1.bf16.msra.mxu0 %v1151_v49 }
 0x315   : > { %v908_v42 = vpop.permute.xlu1 %907 }
 0x316   : > { %v909_v43 = vsel %vm724_vm5, %v906_v23, %v908_v42  ;;  %v910_v44 = vsel %vm724_vm5, %v908_v42, %v906_v23 }
 0x317   : > { %v911_v50 = vmul.f32 %v909_v43, %v1617_v60  ;;  %v912_v52 = vmul.f32 %v910_v44, %v1620_v62 }
 0x319   : > { %v1155_v15 = vpack.c.bf16 %v911_v50, %v903_v45  ;;  %v916_v53 = vpop.permute.xlu1 %915  ;;  %v1153_v16 = vpack.c.bf16 %v912_v52, %v904_v46 }
 0x31a   : > { %v918_v21 = vsel %vm752_vm6, %v916_v53, %v914_v4  ;;  %v917_v54 = vsel %vm752_vm6, %v914_v4, %v916_v53 }
 0x31b   : > { %v920_v55 = vmul.f32 %v918_v21, %v1644_v32  ;;  %1154 = vmatprep.subr.bf16.mxu0 %v1153_v16  ;;  %v919_v51 = vmul.f32 %v917_v54, %v1641_v30 }
 0x31c   : > { %1156 = vmatpush1.bf16.msra.mxu0 %v1155_v15 }
 0x31d   : > { %948 = vmatprep.subr.mxu0 %v920_v55 }
 0x320   : > { %949 = vmatpush1.msra.mxu0 %v919_v51 }
 0x321   : > { %1093 = vmatmul.mubr.msk.f32.vlgmr.msra.gmra.mrb[8].mxu0 %vm928_vm7, %v921_v59 }
 0x322   : > { %v926_v60 = vpop.permute.xlu0 %925 }
 0x3f4   : > { %v998_v62 = vpop.f32.mrb[8].mxu0 }
 0x3f5   : > { %v999_v3 = vadd.f32 %v998_v62, %v926_v60  ;;  %v1000_v58 = vpop.f32.mrb[9].mxu0 }
 0x3f6   : > { %v1001_v18 = vadd.f32 %v1000_v58, %v926_v60 }
 0x3f7   : > { %v1003_v32 = vmax.f32 %v999_v3, 0.0 }
 0x3f8   : > { %v1004_v56 = vmax.f32 %v1001_v18, 0.0 }
 0x3f9   : > { %1005 = vst [vmem:[%s325_s9] sm:$0xff] %v1003_v32 }
 0x3fa   : > { %1006 = vst [vmem:[%s325_s9 + $0x8] sm:$0xff] %v1004_v56 }
 0x3fb PF: > { %s18_s27 = sadd.s32 1, %s1183_s27  }
 0x3fc   : > { %p15_p4 = scmp.ge.s32.totalorder %s18_s27, 4  }
 0x3fe   :  { %17 = sbr.rel (!%p15_p4) target bundleno = 1 (0x1), region = 86 }

</bundles_post_ra>
